<compile_context>
chip_gen: v7x
topology: tpu7x:2x2x1
jax: 0.10.0
libtpu: 0.0.40
codegen_flags: <defaults>
</compile_context>

<pallas_src>
import functools

import jax
import jax.numpy as jnp
from jax.experimental import pallas as pl
from jax.experimental.pallas import tpu as pltpu


DIM_INPUT = 8        # LunarLanderContinuous-v2 observation dim
DIM_ACTIONS = 2      # LunarLanderContinuous-v2 action dim
DIM_NN = 256 * 2     # 512 hidden units
LN_EPS = 1e-5

LANE = 128
SUBLANE = 8
DEFAULT_BLOCK_M = 1024   # batch tile cap (multiple of 8); big tiles amortize per-step overhead


def _round_up(x, m):
    return (x + m - 1) // m * m


def actor_kernel(x_ref, w1_ref, b1_ref, g_ref, beta_ref, w2_ref, b2_ref, o_ref):
    """One batch tile: fc1 -> LayerNorm -> ReLU -> fc2 -> tanh."""
    w1 = w1_ref[...]                          # (din, dnn)   weight dtype (bf16 default)
    w2 = w2_ref[...]                          # (dnn, n_out) weight dtype
    b1 = b1_ref[...].astype(jnp.float32)      # (1, dnn)
    gamma = g_ref[...].astype(jnp.float32)    # (1, dnn)
    beta = beta_ref[...].astype(jnp.float32)  # (1, dnn)
    b2 = b2_ref[...].astype(jnp.float32)      # (1, n_out)

    inv_n = 1.0 / w1.shape[1]

    # fc1 on the MXU with f32 accumulation.  K = din = 8 is tiny and left as-is.
    x = x_ref[...].astype(w1.dtype)
    h = jnp.dot(x, w1, preferred_element_type=jnp.float32) + b1      # (tm, dnn) f32

    # Single-pass LayerNorm over the feature axis (512), eps=1e-5, affine:
    # both moments in one traversal, gamma folded into the rsqrt scale and the
    # mean-subtract folded into the shift (no `centered` temporary).
    s1 = jnp.sum(h, axis=-1, keepdims=True)
    s2 = jnp.sum(h * h, axis=-1, keepdims=True)
    mean = s1 * inv_n
    var = s2 * inv_n - mean * mean
    scale = gamma * jax.lax.rsqrt(var + LN_EPS)                      # (tm, dnn)
    hn = h * scale + (beta - mean * scale)

    # ReLU (f32 on the VPU; v5e-safe).
    hr = jnp.maximum(hn, 0.0)

    # fc2 into the 8-lane-padded action head, then tanh (EUP) on just 8 lanes.
    out = jnp.dot(hr.astype(w2.dtype), w2, preferred_element_type=jnp.float32) + b2
    o_ref[...] = jnp.tanh(out).astype(o_ref.dtype)


@functools.partial(jax.jit, static_argnames=("block_m",))
def actor_forward(state, w1, b1, gamma, beta, w2_padded, b2_padded,
                  *, block_m=DEFAULT_BLOCK_M):
    """Actor forward.  Expects fc2 weights/bias already padded by `pad_fc2`."""
    batch, din = state.shape
    dnn, n_out = w2_padded.shape

    # Batch tiling: aim for >= 2 tiles so ("parallel",) actually shards across
    # v7x's two TensorCores; tm is a multiple of 8 capped at block_m.  No
    # explicit batch padding — Pallas handles the ragged last block; its junk
    # rows stay row-local and the out-of-bounds part of the output block is not
    # written back to HBM (we only ever read rows < batch).
    if batch <= SUBLANE:
        tm = batch
    else:
        tm = min(block_m, _round_up((batch + 1) // 2, SUBLANE))
    grid = (pl.cdiv(batch, tm),)

    out = pl.pallas_call(
        actor_kernel,
        out_shape=jax.ShapeDtypeStruct((batch, n_out), jnp.float32),
        grid=grid,
        in_specs=[
            pl.BlockSpec((tm, din), lambda i: (i, 0)),      # x   (pipelined over batch)
            # Weights/biases: constant index_map -> DMA'd once, VMEM-resident
            # across all grid steps (~140 KiB total with bf16 W1/W2; the extra
            # default double buffer is immaterial at this VMEM budget).
            pl.BlockSpec((din, dnn), lambda i: (0, 0)),     # W1
            pl.BlockSpec((1, dnn), lambda i: (0, 0)),       # b1
            pl.BlockSpec((1, dnn), lambda i: (0, 0)),       # gamma
            pl.BlockSpec((1, dnn), lambda i: (0, 0)),       # beta
            pl.BlockSpec((dnn, n_out), lambda i: (0, 0)),   # W2 (8-lane padded)
            pl.BlockSpec((1, n_out), lambda i: (0, 0)),     # b2 (8-lane padded)
        ],
        out_specs=pl.BlockSpec((tm, n_out), lambda i: (i, 0)),
        compiler_params=pltpu.CompilerParams(
            dimension_semantics=("parallel",),   # shard batch tiles across TCs (v7x)
            vmem_limit_bytes=32 << 20,           # tm=1024 worst case ~12 MiB of temporaries
        ),
    )(state, w1, b1, gamma, beta, w2_padded, b2_padded)

    # Slice away the (tiny) lane padding of the action head.
    return out[:, :DIM_ACTIONS]


def pad_fc2(w2, b2):
    """One-time parameter prep (hoisted out of the per-call path).

    Pads fc2 output features up to a multiple of 8 so the kernel's output block
    covers the full (small) last dim: contiguous 32 B/row writeback instead of
    a 128-lane (512 B/row) padded store, and 16x fewer tanh evaluations.
    """
    dnn, dact = w2.shape
    n_out = _round_up(dact, SUBLANE)
    w2p = jnp.zeros((dnn, n_out), w2.dtype).at[:, :dact].set(w2)
    b2p = jnp.zeros((1, n_out), jnp.float32).at[:, :dact].set(
        jnp.asarray(b2, jnp.float32).reshape(1, dact))
    return w2p, b2p


def init_params(key, dtype=jnp.bfloat16):
    """Deterministic synthetic parameters matching the PyTorch module shapes.

    W1/W2 default to bf16 (MXU-native on every TPU generation, half the weight
    DMA/VMEM).  Biases / LayerNorm params and all elementwise math stay f32
    (required on v5e: no bf16 VPU/EUP).  Pass dtype=jnp.float32 for full f32.
    """
    k1, k2, k3, k4 = jax.random.split(key, 4)
    # PyTorch Linear default init: U(-1/sqrt(fan_in), 1/sqrt(fan_in))
    bound1 = 1.0 / jnp.sqrt(DIM_INPUT)
    bound2 = 1.0 / jnp.sqrt(DIM_NN)
    w1 = jax.random.uniform(k1, (DIM_INPUT, DIM_NN), jnp.float32, -bound1, bound1).astype(dtype)
    b1 = jax.random.uniform(k2, (1, DIM_NN), jnp.float32, -bound1, bound1)
    w2 = jax.random.uniform(k3, (DIM_NN, DIM_ACTIONS), jnp.float32, -bound2, bound2).astype(dtype)
    b2 = jax.random.uniform(k4, (1, DIM_ACTIONS), jnp.float32, -bound2, bound2)
    # LayerNorm default init: weight = 1, bias = 0.
    gamma = jnp.ones((1, DIM_NN), jnp.float32)
    beta = jnp.zeros((1, DIM_NN), jnp.float32)
    return w1, b1, gamma, beta, w2, b2


def reference_forward(state, w1, b1, gamma, beta, w2, b2):
    h = state @ w1.astype(jnp.float32) + b1
    mean = jnp.mean(h, axis=-1, keepdims=True)
    var = jnp.mean((h - mean) ** 2, axis=-1, keepdims=True)
    hn = (h - mean) / jnp.sqrt(var + LN_EPS) * gamma + beta
    hr = jnp.maximum(hn, 0.0)
    return jnp.tanh(hr @ w2.astype(jnp.float32) + b2)


if __name__ == "__main__":
    key = jax.random.PRNGKey(0)
    k_state, k_state2, k_params = jax.random.split(key, 3)

    # Default bf16 weights (mixed precision) -> loose tolerance vs f32 reference.
    w1, b1, gamma, beta, w2, b2 = init_params(k_params)
    w2p, b2p = pad_fc2(w2, b2)   # one-time prep, outside the per-call path

    # Small batch: single tile.
    batch = 8
    state = jax.random.normal(k_state, (batch, DIM_INPUT), jnp.float32)
    out = jax.block_until_ready(actor_forward(state, w1, b1, gamma, beta, w2p, b2p))
    ref = reference_forward(state, w1, b1, gamma, beta, w2, b2)
    assert out.shape == (batch, DIM_ACTIONS)
    assert jnp.allclose(out, ref, atol=2e-2, rtol=2e-2), "mismatch vs reference (bf16, batch=8)"

    # Non-multiple batch: two-tile parallel grid + ragged last block, no host-side padding.
    batch2 = 1000
    state2 = jax.random.normal(k_state2, (batch2, DIM_INPUT), jnp.float32)
    out2 = jax.block_until_ready(actor_forward(state2, w1, b1, gamma, beta, w2p, b2p))
    ref2 = reference_forward(state2, w1, b1, gamma, beta, w2, b2)
    assert out2.shape == (batch2, DIM_ACTIONS)
    assert jnp.all(jnp.isfinite(out2))
    assert jnp.allclose(out2, ref2, atol=2e-2, rtol=2e-2), "mismatch vs reference (bf16, batch=1000)"

    # f32 weights: tight-tolerance check of the kernel math itself
    # (single-pass LayerNorm variance included).
    p32 = init_params(k_params, dtype=jnp.float32)
    w2p32, b2p32 = pad_fc2(p32[4], p32[5])
    out32 = jax.block_until_ready(
        actor_forward(state2, p32[0], p32[1], p32[2], p32[3], w2p32, b2p32))
    ref32 = reference_forward(state2, *p32)
    assert jnp.allclose(out32, ref32, atol=1e-4, rtol=1e-4), "mismatch vs reference (f32)"

    print("KERNEL_OK")
</pallas_src>

<mosaic_0001>
module attributes {stable_mosaic.version = 11 : i64} {
  func.func @actor_kernel(%arg0: i32, %arg1: memref<8x8xf32, #tpu.memory_space<vmem>>, %arg2: memref<8x512xbf16, #tpu.memory_space<vmem>>, %arg3: memref<1x512xf32, #tpu.memory_space<vmem>>, %arg4: memref<1x512xf32, #tpu.memory_space<vmem>>, %arg5: memref<1x512xf32, #tpu.memory_space<vmem>>, %arg6: memref<512x8xbf16, #tpu.memory_space<vmem>>, %arg7: memref<1x8xf32, #tpu.memory_space<vmem>>, %arg8: memref<8x8xf32, #tpu.memory_space<vmem>>) attributes {dimension_semantics = [#tpu.dimension_semantics<parallel>], iteration_bounds = array<i64: 1>, scalar_prefetch = 0 : i64, scratch_operands = 0 : i64, tpu.core_type = #tpu.core_type<tc>, window_params = [{transform_indices = @transform_0, window_bounds = array<i64: 8, 8>}, {pipeline_mode = #tpu.pipeline_mode<synchronous>, transform_indices = @transform_1, window_bounds = array<i64: 8, 512>}, {pipeline_mode = #tpu.pipeline_mode<synchronous>, transform_indices = @transform_2, window_bounds = array<i64: 1, 512>}, {pipeline_mode = #tpu.pipeline_mode<synchronous>, transform_indices = @transform_3, window_bounds = array<i64: 1, 512>}, {pipeline_mode = #tpu.pipeline_mode<synchronous>, transform_indices = @transform_4, window_bounds = array<i64: 1, 512>}, {pipeline_mode = #tpu.pipeline_mode<synchronous>, transform_indices = @transform_5, window_bounds = array<i64: 512, 8>}, {pipeline_mode = #tpu.pipeline_mode<synchronous>, transform_indices = @transform_6, window_bounds = array<i64: 1, 8>}, {transform_indices = @transform_7, window_bounds = array<i64: 8, 8>}]} {
    %c0 = arith.constant 0 : index
    %c0_0 = arith.constant 0 : index
    %0 = vector.load %arg2[%c0, %c0_0] : memref<8x512xbf16, #tpu.memory_space<vmem>>, vector<8x512xbf16>
    %c0_1 = arith.constant 0 : index
    %c0_2 = arith.constant 0 : index
    %1 = vector.load %arg6[%c0_1, %c0_2] : memref<512x8xbf16, #tpu.memory_space<vmem>>, vector<512x8xbf16>
    %c0_3 = arith.constant 0 : index
    %c0_4 = arith.constant 0 : index
    %2 = vector.load %arg3[%c0_3, %c0_4] : memref<1x512xf32, #tpu.memory_space<vmem>>, vector<1x512xf32>
    %c0_5 = arith.constant 0 : index
    %c0_6 = arith.constant 0 : index
    %3 = vector.load %arg4[%c0_5, %c0_6] : memref<1x512xf32, #tpu.memory_space<vmem>>, vector<1x512xf32>
    %c0_7 = arith.constant 0 : index
    %c0_8 = arith.constant 0 : index
    %4 = vector.load %arg5[%c0_7, %c0_8] : memref<1x512xf32, #tpu.memory_space<vmem>>, vector<1x512xf32>
    %c0_9 = arith.constant 0 : index
    %c0_10 = arith.constant 0 : index
    %5 = vector.load %arg7[%c0_9, %c0_10] : memref<1x8xf32, #tpu.memory_space<vmem>>, vector<1x8xf32>
    %c0_11 = arith.constant 0 : index
    %c0_12 = arith.constant 0 : index
    %6 = vector.load %arg1[%c0_11, %c0_12] : memref<8x8xf32, #tpu.memory_space<vmem>>, vector<8x8xf32>
    %7 = arith.truncf %6 : vector<8x8xf32> to vector<8x8xbf16>
    %cst = arith.constant dense<0.000000e+00> : vector<8x512xf32>
    %8 = tpu.matmul %7, %0, %cst {dimension_numbers = #tpu.dot_dimension_numbers<[1], [0], [0], [1], [0, 0, 1, 1], [], []>} : vector<8x8xbf16>, vector<8x512xbf16>, vector<8x512xf32> -> vector<8x512xf32>
    %9 = vector.broadcast %2 : vector<1x512xf32> to vector<8x512xf32>
    %10 = arith.addf %8, %9 : vector<8x512xf32>
    %cst_13 = arith.constant dense<0.000000e+00> : vector<8xf32>
    %11 = vector.multi_reduction <add>, %10, %cst_13 [1] : vector<8x512xf32> to vector<8xf32>
    %12 = vector.shape_cast %11 : vector<8xf32> to vector<8x1xf32>
    %13 = arith.mulf %10, %10 : vector<8x512xf32>
    %cst_14 = arith.constant dense<0.000000e+00> : vector<8xf32>
    %14 = vector.multi_reduction <add>, %13, %cst_14 [1] : vector<8x512xf32> to vector<8xf32>
    %15 = vector.shape_cast %14 : vector<8xf32> to vector<8x1xf32>
    %cst_15 = arith.constant 0.001953125 : f32
    %16 = vector.broadcast %cst_15 : f32 to vector<8x1xf32>
    %17 = arith.mulf %12, %16 : vector<8x1xf32>
    %cst_16 = arith.constant 0.001953125 : f32
    %18 = vector.broadcast %cst_16 : f32 to vector<8x1xf32>
    %19 = arith.mulf %15, %18 : vector<8x1xf32>
    %20 = arith.mulf %17, %17 : vector<8x1xf32>
    %21 = arith.subf %19, %20 : vector<8x1xf32>
    %cst_17 = arith.constant 9.99999974E-6 : f32
    %22 = vector.broadcast %cst_17 : f32 to vector<8x1xf32>
    %23 = arith.addf %21, %22 : vector<8x1xf32>
    %24 = math.rsqrt %23 : vector<8x1xf32>
    %25 = vector.broadcast %3 : vector<1x512xf32> to vector<8x512xf32>
    %26 = vector.broadcast %24 : vector<8x1xf32> to vector<8x512xf32>
    %27 = arith.mulf %25, %26 : vector<8x512xf32>
    %28 = arith.mulf %10, %27 : vector<8x512xf32>
    %29 = vector.broadcast %17 : vector<8x1xf32> to vector<8x512xf32>
    %30 = arith.mulf %29, %27 : vector<8x512xf32>
    %31 = vector.broadcast %4 : vector<1x512xf32> to vector<8x512xf32>
    %32 = arith.subf %31, %30 : vector<8x512xf32>
    %33 = arith.addf %28, %32 : vector<8x512xf32>
    %cst_18 = arith.constant 0.000000e+00 : f32
    %34 = vector.broadcast %cst_18 : f32 to vector<8x512xf32>
    %35 = arith.maximumf %33, %34 : vector<8x512xf32>
    %36 = arith.truncf %35 : vector<8x512xf32> to vector<8x512xbf16>
    %cst_19 = arith.constant dense<0.000000e+00> : vector<8x8xf32>
    %37 = tpu.matmul %36, %1, %cst_19 {dimension_numbers = #tpu.dot_dimension_numbers<[1], [0], [0], [1], [0, 0, 1, 1], [], []>} : vector<8x512xbf16>, vector<512x8xbf16>, vector<8x8xf32> -> vector<8x8xf32>
    %38 = vector.broadcast %5 : vector<1x8xf32> to vector<8x8xf32>
    %39 = arith.addf %37, %38 : vector<8x8xf32>
    %40 = math.tanh %39 : vector<8x8xf32>
    %c0_20 = arith.constant 0 : index
    %c0_21 = arith.constant 0 : index
    %41 = vector.load %arg8[%c0_20, %c0_21] : memref<8x8xf32, #tpu.memory_space<vmem>>, vector<8x8xf32>
    tpu.vector_store %arg8[%c0_20, %c0_21], %40 {strides = array<i32>} : memref<8x8xf32, #tpu.memory_space<vmem>>, vector<8x8xf32>,
    return
  }
  func.func @transform_0(%arg0: i32) -> (i32, i32) {
    %c0_i32 = arith.constant 0 : i32
    %c0_i32_0 = arith.constant 0 : i32
    return %arg0, %c0_i32 : i32, i32
  }
  func.func @transform_1(%arg0: i32) -> (i32, i32) {
    %c0_i32 = arith.constant 0 : i32
    %c0_i32_0 = arith.constant 0 : i32
    %c0_i32_1 = arith.constant 0 : i32
    return %c0_i32, %c0_i32_0 : i32, i32
  }
  func.func @transform_2(%arg0: i32) -> (i32, i32) {
    %c0_i32 = arith.constant 0 : i32
    %c0_i32_0 = arith.constant 0 : i32
    %c0_i32_1 = arith.constant 0 : i32
    return %c0_i32, %c0_i32_0 : i32, i32
  }
  func.func @transform_3(%arg0: i32) -> (i32, i32) {
    %c0_i32 = arith.constant 0 : i32
    %c0_i32_0 = arith.constant 0 : i32
    %c0_i32_1 = arith.constant 0 : i32
    return %c0_i32, %c0_i32_0 : i32, i32
  }
  func.func @transform_4(%arg0: i32) -> (i32, i32) {
    %c0_i32 = arith.constant 0 : i32
    %c0_i32_0 = arith.constant 0 : i32
    %c0_i32_1 = arith.constant 0 : i32
    return %c0_i32, %c0_i32_0 : i32, i32
  }
  func.func @transform_5(%arg0: i32) -> (i32, i32) {
    %c0_i32 = arith.constant 0 : i32
    %c0_i32_0 = arith.constant 0 : i32
    %c0_i32_1 = arith.constant 0 : i32
    return %c0_i32, %c0_i32_0 : i32, i32
  }
  func.func @transform_6(%arg0: i32) -> (i32, i32) {
    %c0_i32 = arith.constant 0 : i32
    %c0_i32_0 = arith.constant 0 : i32
    %c0_i32_1 = arith.constant 0 : i32
    return %c0_i32, %c0_i32_0 : i32, i32
  }
  func.func @transform_7(%arg0: i32) -> (i32, i32) {
    %c0_i32 = arith.constant 0 : i32
    %c0_i32_0 = arith.constant 0 : i32
    return %arg0, %c0_i32 : i32, i32
  }
}

</mosaic_0001>

<bundles_post_ra>
// kernel: actor_forward.1
= control target key start
LH: loop header
LB: loop body
LE: loop exit
PB: predicated region body
PF: predicated region fallthrough
CT: control target
= control target key end

     0   :  { %vm134_vm0 = vcmask 1043456   ;;  %v729_v2 = vmov 0   ;;  %vm130_vm1 = vcmask 64512   ;;  %v100_v11 = vlaneseq  ;;  %s937_s1 = inlined_call_operand.vmem [shape: bf16[8,512], index: 1, kind: input, shape index: {}]   ;;  %s938_s0 = inlined_call_operand.vmem [shape: f32[8,8], index: 0, kind: input, shape index: {}]   ;;  %s939_s2 = inlined_call_operand.vmem [shape: f32[1,512], index: 2, kind: input, shape index: {}]   ;;  %s940_s5 = inlined_call_operand.vmem [shape: bf16[512,8], index: 5, kind: input, shape index: {}]   ;;  %s941_s3 = inlined_call_operand.vmem [shape: f32[1,512], index: 3, kind: input, shape index: {}]   ;;  %s942_s4 = inlined_call_operand.vmem [shape: f32[1,512], index: 4, kind: input, shape index: {}]   ;;  %s943_s6 = inlined_call_operand.vmem [shape: f32[1,8], index: 6, kind: input, shape index: {}]   ;;  %s944_s7 = inlined_call_operand.vmem [shape: f32[8,8], index: 7, kind: output, shape index: {}]  }
   0x1   :  { %v27_v0 = vld [vmem:[%s937_s1] sm:$0xff]  ;;  %v28_v1 = vld [vmem:[%s937_s1 + $0x8] sm:$0xff]  ;;  %179 = vmatprep.mubr.bf16.mxu0 %v729_v2  ;;  %220 = vmatprep.mubr.bf16.mxu1 %v729_v2  ;;  %v701_v52 = vld [vmem:[%s940_s5 + $0x50] sm:$0xff]  }
   0x2   :  { %v97_v3 = vld [vmem:[%s938_s0] sm:$0xff]  ;;  %v604_v4 = vcombine.high %v27_v0, %v27_v0  ;;  %v606_v5 = vcombine.high %v28_v1, %v28_v1  ;;  %v603_v6 = vcombine.low %v27_v0, %v27_v0  ;;  %v605_v7 = vcombine.low %v28_v1, %v28_v1  ;;  %v697_v48 = vld [vmem:[%s940_s5 + $0x48] sm:$0xff]   ;;  %v702_v53 = vld [vmem:[%s940_s5 + $0xd0] sm:$0xff]  }
   0x3   :  { %v98_v10 = vpack.c.bf16 %v97_v3, %v97_v3  ;;  %v101_v12 = vshrl.u32 %v100_v11, 7  ;;  %v93_v15 = vld [vmem:[%s939_s2] sm:$0xf]  ;;  %v698_v49 = vld [vmem:[%s940_s5 + $0xc8] sm:$0xff]   ;;  %v703_v54 = vld [vmem:[%s940_s5 + $0x10] sm:$0xff]  }
   0x4   :  { %607 = vmatprep.subr.msk.bf16.mxu0 %vm134_vm0, %v604_v4  ;;  %609 = vmatprep.subr.msk.bf16.mxu1 %vm134_vm0, %v606_v5  ;;  %v136_v8 = vsel %vm134_vm0, %v603_v6, 0  ;;  %v142_v9 = vsel %vm134_vm0, %v605_v7, 0  ;;  %v693_v44 = vld [vmem:[%s940_s5 + $0x40] sm:$0xff]   ;;  %v699_v50 = vld [vmem:[%s940_s5 + $0x8] sm:$0xff]   ;;  %v704_v55 = vld [vmem:[%s940_s5 + $0x90] sm:$0xff]  }
   0x5   :  { %148 = vmatpush1.bf16.msra.mxu0 %v136_v8  ;;  %189 = vmatpush1.bf16.msra.mxu1 %v142_v9  ;;  %v781_v13 = vsub.s32 0, %v101_v12  ;;  %v783_v14 = vsub.s32 2, %v101_v12  ;;  %v788_v16 = vsub.s32 1, %v101_v12  ;;  %v793_v20 = vsub.s32 3, %v101_v12  ;;  %v694_v45 = vld [vmem:[%s940_s5 + $0xc0] sm:$0xff]   ;;  %v700_v51 = vld [vmem:[%s940_s5 + $0x88] sm:$0xff]  }
   0x6   :  { %644 = vmatprep.subr.bf16.mxu0 %v693_v44  ;;  %v695_v46 = vld [vmem:[%s940_s5] sm:$0xff]   ;;  %666 = vmatprep.subr.bf16.mxu1 %v694_v45  ;;  %v705_v56 = vld [vmem:[%s940_s5 + $0x58] sm:$0xff]   ;;  %v713_v0 = vld [vmem:[%s940_s5 + $0x68] sm:$0xff]  }
   0x7   :  { %v103_v17 = vrot.slane %v93_v15, %v781_v13  ;;  %v111_v18 = vrot.slane %v93_v15, %v783_v14  ;;  %v107_v19 = vrot.slane %v93_v15, %v788_v16  ;;  %v115_v28 = vrot.slane %v93_v15, %v793_v20  ;;  %v696_v47 = vld [vmem:[%s940_s5 + $0x80] sm:$0xff]   ;;  %v706_v57 = vld [vmem:[%s940_s5 + $0xd8] sm:$0xff]   ;;  %v714_v1 = vld [vmem:[%s940_s5 + $0xe8] sm:$0xff]  }
   0x8   :  { %608 = vmatmul.mubr.msk.bf16.vlgmr.msra.gmra.mrb[0].mxu0 %vm130_vm1, %v98_v10  ;;  %610 = vmatmul.mubr.msk.bf16.vlgmr.msra.gmra.mrb[0].mxu1 %vm130_vm1, %v98_v10  ;;  %v707_v58 = vld [vmem:[%s940_s5 + $0x18] sm:$0xff]   ;;  %v709_v60 = vld [vmem:[%s940_s5 + $0x60] sm:$0xff]   ;;  %v715_v2 = vld [vmem:[%s940_s5 + $0x28] sm:$0xff]  }
   0x9   :  { %645 = vmatpush3.bf16.msra.mxu0 %v695_v46  ;;  %667 = vmatpush3.bf16.msra.mxu1 %v696_v47  ;;  %v708_v59 = vld [vmem:[%s940_s5 + $0x98] sm:$0xff]   ;;  %v710_v61 = vld [vmem:[%s940_s5 + $0xe0] sm:$0xff]   ;;  %v716_v3 = vld [vmem:[%s940_s5 + $0xa8] sm:$0xff]  }
   0xa   :  { %646 = vmatprep.subr.bf16.mxu0 %v697_v48  ;;  %668 = vmatprep.subr.bf16.mxu1 %v698_v49  ;;  %v711_v62 = vld [vmem:[%s940_s5 + $0x20] sm:$0xff]   ;;  %v717_v4 = vld [vmem:[%s940_s5 + $0x70] sm:$0xff]   ;;  %v721_v8 = vld [vmem:[%s940_s5 + $0x78] sm:$0xff]  }
   0xb   :  { %v712_v63 = vld [vmem:[%s940_s5 + $0xa0] sm:$0xff]   ;;  %v718_v5 = vld [vmem:[%s940_s5 + $0xf0] sm:$0xff]   ;;  %v722_v9 = vld [vmem:[%s940_s5 + $0xf8] sm:$0xff]  }
   0xc   :  { %v719_v6 = vld [vmem:[%s940_s5 + $0x30] sm:$0xff]   ;;  %v723_v10 = vld [vmem:[%s940_s5 + $0x38] sm:$0xff]  }
   0xd   :  { %647 = vmatpush3.bf16.msra.mxu0 %v699_v50  ;;  %669 = vmatpush3.bf16.msra.mxu1 %v700_v51  ;;  %v720_v7 = vld [vmem:[%s940_s5 + $0xb0] sm:$0xff]   ;;  %v724_v11 = vld [vmem:[%s940_s5 + $0xb8] sm:$0xff]  }
   0xe   :  { %648 = vmatprep.subr.bf16.mxu0 %v701_v52  ;;  %670 = vmatprep.subr.bf16.mxu1 %v702_v53 }
  0x11   :  { %649 = vmatpush3.bf16.msra.mxu0 %v703_v54  ;;  %671 = vmatpush3.bf16.msra.mxu1 %v704_v55 }
  0x12   :  { %650 = vmatprep.subr.bf16.mxu0 %v705_v56  ;;  %672 = vmatprep.subr.bf16.mxu1 %v706_v57 }
  0x15   :  { %651 = vmatpush3.bf16.msra.mxu0 %v707_v58  ;;  %673 = vmatpush3.bf16.msra.mxu1 %v708_v59 }
  0x16   :  { %652 = vmatprep.subr.bf16.mxu0 %v709_v60  ;;  %674 = vmatprep.subr.bf16.mxu1 %v710_v61 }
  0x19   :  { %653 = vmatpush3.bf16.msra.mxu0 %v711_v62  ;;  %675 = vmatpush3.bf16.msra.mxu1 %v712_v63 }
  0x1a   :  { %654 = vmatprep.subr.bf16.mxu0 %v713_v0  ;;  %676 = vmatprep.subr.bf16.mxu1 %v714_v1 }
  0x1d   :  { %655 = vmatpush3.bf16.msra.mxu0 %v715_v2  ;;  %677 = vmatpush3.bf16.msra.mxu1 %v716_v3 }
  0x1e   :  { %656 = vmatprep.subr.bf16.mxu0 %v717_v4  ;;  %678 = vmatprep.subr.bf16.mxu1 %v718_v5 }
  0x21   :  { %657 = vmatpush3.bf16.msra.mxu0 %v719_v6  ;;  %679 = vmatpush3.bf16.msra.mxu1 %v720_v7 }
  0x22   :  { %658 = vmatprep.subr.bf16.mxu0 %v721_v8  ;;  %680 = vmatprep.subr.bf16.mxu1 %v722_v9 }
  0x25   :  { %659 = vmatpush3.bf16.msra.mxu0 %v723_v10  ;;  %681 = vmatpush3.bf16.msra.mxu1 %v724_v11 }
  0xdb   :  { %v181_v21 = vpop.f32.mrb[0].mxu0  ;;  %v222_v22 = vpop.f32.mrb[0].mxu1 }
  0xdc   :  { %v795_v23 = vadd.f32 %v181_v21, %v103_v17  ;;  %v797_v24 = vadd.f32 %v222_v22, %v111_v18  ;;  %v183_v25 = vpop.f32.mrb[1].mxu0  ;;  %v224_v26 = vpop.f32.mrb[1].mxu1 }
  0xdd   :  { %v799_v27 = vadd.f32 %v183_v25, %v107_v19  ;;  %v185_v29 = vpop.f32.mrb[2].mxu0  ;;  %v226_v30 = vpop.f32.mrb[2].mxu1  ;;  %v810_v37 = vadd.f32 %v224_v26, %v115_v28  ;;  %v94_v25 = vld [vmem:[%s941_s3] sm:$0xf] }
  0xde   :  { %v234_v31 = vmul.f32 %v795_v23, %v795_v23  ;;  %v186_v32 = vpop.f32.mrb[3].mxu0  ;;  %v227_v33 = vpop.f32.mrb[3].mxu1  ;;  %v236_v34 = vmul.f32 %v797_v24, %v797_v24  ;;  %v95_v26 = vld [vmem:[%s942_s4] sm:$0xf]  ;;  %v253_v28 = vrot.slane %v94_v25, %v781_v13  ;;  %v261_v29 = vrot.slane %v94_v25, %v783_v14 }
  0xdf   :  { %v235_v35 = vmul.f32 %v799_v27, %v799_v27  ;;  %v229_v36 = vadd.f32 %v799_v27, %v795_v23  ;;  %v237_v42 = vmul.f32 %v810_v37, %v810_v37  ;;  %v257_v30 = vrot.slane %v94_v25, %v788_v16 }
  0xe0   :  { %v290_v33 = vrot.slane %v95_v26, %v788_v16 }
  0xe1   :  { %v230_v38 = vadd.f32 %v229_v36, %v797_v24  ;;  %v238_v39 = vadd.f32 %v235_v35, %v234_v31  ;;  %v265_v31 = vrot.slane %v94_v25, %v793_v20 }
  0xe3   :  { %v231_v40 = vadd.f32 %v230_v38, %v810_v37  ;;  %v239_v41 = vadd.f32 %v238_v39, %v236_v34  ;;  %v298_v34 = vrot.slane %v95_v26, %v793_v20 }
  0xe5   :  { %232 = vadd.xlane.f32.xlu0 %v231_v40  ;;  %v240_v43 = vadd.f32 %v239_v41, %v237_v42  ;;  %v286_v40 = vrot.slane %v95_v26, %v781_v13  ;;  %v294_v41 = vrot.slane %v95_v26, %v783_v14 }
  0xe9   :  { %241 = vadd.xlane.f32.xlu0 %v240_v43 }
 0x172   :  { %v233_v12 = vpop.xlane.xlu0 %232 }
 0x173   :  { %v243_v15 = vmul.f32 0.001953125, %v233_v12 }
 0x175   :  { %v245_v18 = vmul.f32 %v243_v15, %v243_v15 }
 0x176   :  { %v242_v17 = vpop.xlane.xlu0 %241 }
 0x177   :  { %v244_v19 = vmul.f32 0.001953125, %v242_v17 }
 0x179   :  { %v246_v21 = vsub.f32 %v244_v19, %v245_v18 }
 0x17b   :  { %v247_v22 = vadd.f32 1e-05, %v246_v21 }
 0x17d   :  { %725 = vrsqrt.f32 %v247_v22 }
 0x187   :  { %v726_v32 = vpop.eup %725 }
 0x188   :  { %v271_v35 = vmul.f32 %v726_v32, %v257_v30  ;;  %v273_v36 = vmul.f32 %v726_v32, %v265_v31  ;;  %v270_v38 = vmul.f32 %v726_v32, %v253_v28  ;;  %v272_v39 = vmul.f32 %v726_v32, %v261_v29 }
 0x18a   :  { %v279_v42 = vmul.f32 %v271_v35, %v243_v15  ;;  %v281_v43 = vmul.f32 %v273_v36, %v243_v15  ;;  %v278_v44 = vmul.f32 %v270_v38, %v243_v15  ;;  %v280_v45 = vmul.f32 %v272_v39, %v243_v15 }
 0x18b   :  { %v275_v46 = vmul.f32 %v271_v35, %v799_v27  ;;  %v277_v48 = vmul.f32 %v273_v36, %v810_v37  ;;  %v274_v20 = vmul.f32 %v270_v38, %v795_v23  ;;  %v276_v50 = vmul.f32 %v272_v39, %v797_v24  ;;  %v611_v24 = vld [vmem:[%s943_s6] ss:$0 sm:$0xff] }
 0x18c   :  { %v304_v47 = vsub.f32 %v290_v33, %v279_v42  ;;  %v306_v16 = vsub.f32 %v298_v34, %v281_v43  ;;  %v303_v49 = vsub.f32 %v286_v40, %v278_v44  ;;  %v305_v51 = vsub.f32 %v294_v41, %v280_v45 }
 0x18e   :  { %v308_v52 = vadd.f32 %v304_v47, %v275_v46  ;;  %v310_v13 = vadd.f32 %v306_v16, %v277_v48  ;;  %v307_v53 = vadd.f32 %v303_v49, %v274_v20  ;;  %v309_v14 = vadd.f32 %v305_v51, %v276_v50 }
 0x190   :  { %v312_v54 = vmax.f32 %v308_v52, 0.0  ;;  %v314_v55 = vmax.f32 %v310_v13, 0.0  ;;  %v311_v56 = vmax.f32 %v307_v53, 0.0  ;;  %v313_v57 = vmax.f32 %v309_v14, 0.0 }
 0x192   :  { %v316_v58 = vpack.c.bf16 %v312_v54, %v312_v54  ;;  %v318_v27 = vpack.c.bf16 %v314_v55, %v314_v55  ;;  %v315_v59 = vpack.c.bf16 %v311_v56, %v311_v56  ;;  %v317_v60 = vpack.c.bf16 %v313_v57, %v313_v57 }
 0x194   :  { %549 = vmatprep.mubr.bf16.mxu0 %v316_v58  ;;  %589 = vmatprep.mubr.bf16.mxu1 %v318_v27 }
 0x195   :  { %550 = vmatmul.mubr.bf16.vlgmr.msra.gmra.mrb[4].mxu0 %v315_v59  ;;  %590 = vmatmul.mubr.bf16.vlgmr.msra.gmra.mrb[4].mxu1 %v317_v60 }
 0x268   :  { %v660_v23 = vpop.f32.mrb[4].mxu0  ;;  %v682_v37 = vpop.f32.mrb[4].mxu1 }
 0x269   :  { %v661_v61 = vpop.f32.mrb[5].mxu0  ;;  %v683_v62 = vpop.f32.mrb[5].mxu1 }
 0x26a   :  { %v662_v63 = vadd.f32 %v661_v61, %v660_v23  ;;  %v684_v0 = vadd.f32 %v683_v62, %v682_v37  ;;  %v663_v1 = vpop.f32.mrb[6].mxu0  ;;  %v685_v2 = vpop.f32.mrb[6].mxu1 }
 0x26b   :  { %v664_v3 = vpop.f32.mrb[7].mxu0  ;;  %v686_v4 = vpop.f32.mrb[7].mxu1 }
 0x26c   :  { %v552_v5 = vadd.f32 %v662_v63, %v611_v24 }
 0x26e   :  { %v592_v6 = vadd.f32 %v684_v0, %v552_v5 }
 0x270   :  { %727 = vtanh.f32 %v592_v6 }
 0x27a   :  { %v728_v7 = vpop.eup %727 }
 0x27b   :  { %598 = vst.msk [vmem:[%s944_s7] sm:$0xff] %vm130_vm1, %v728_v7 }

</bundles_post_ra>
